<compile_context>
chip_gen: v5e
topology: v5e:2x2
jax: 0.10.0
libtpu: 0.0.40
codegen_flags: <defaults>
</compile_context>

<pallas_src>
import functools

import jax
import jax.numpy as jnp
from jax.experimental import pallas as pl
from jax.experimental.pallas import tpu as pltpu

_BN_EPS = 1e-5


def _vmem_budgets():
    cap = 128 * 1024 * 1024
    try:
        info = pltpu.get_tpu_info()
        cap = int(getattr(info, "vmem_capacity_bytes", cap))
    except Exception:
        pass
    if cap <= 64 * 1024 * 1024:                 # v7x-class: 64 MiB / TensorCore
        return 36 * 1024 * 1024, 10 * 1024 * 1024
    return 48 * 1024 * 1024, 20 * 1024 * 1024   # v5e / v6e: 128 MiB


_VMEM_LIMIT, _FUSE_VMEM_BYTES = _vmem_budgets()


# --------------------------------------------------------------------------
# Pallas kernels
# --------------------------------------------------------------------------
def _matmul_kernel(a_ref, b_ref, o_ref):
    # (tm, K)bf16 @ (K, tn)bf16 -> MXU, f32 accumulation, bf16 store
    o_ref[...] = jnp.dot(a_ref[...], b_ref[...],
                         preferred_element_type=jnp.float32).astype(o_ref.dtype)


def _bn_relu_fused_kernel(*refs, inv_count, eps, chunk_rows, has_fold):
    # One pass over y resident in VMEM: per-channel mean / centered variance
    # (two-pass formula) then affine+ReLU, bf16 store.
    if has_fold:
        y_ref, g_ref, b_ref, fold_ref, o_ref = refs
    else:
        y_ref, g_ref, b_ref, o_ref = refs
    rows, lanes = y_ref.shape
    nchunk = rows // chunk_rows

    def per_channel(v):
        # fold per-lane sums to per-channel sums (broadcast back over lanes)
        # with a tiny constant 0/1 matmul; identity when lane == channel.
        if has_fold:
            return jnp.dot(v, fold_ref[...], preferred_element_type=jnp.float32)
        return v

    if nchunk == 1:
        # block is small: single-shot whole-block path
        y = y_ref[...].astype(jnp.float32)
        mean = per_channel(jnp.sum(y, axis=0, keepdims=True)) * inv_count
        d = y - mean
        var = per_channel(jnp.sum(d * d, axis=0, keepdims=True)) * inv_count
        scale = g_ref[...] * jax.lax.rsqrt(var + eps)
        o_ref[...] = jnp.maximum(d * scale + b_ref[...], 0.0).astype(o_ref.dtype)
        return

    # chunked path: f32 temporaries stay ~O(chunk), not O(block)
    def row0(i):
        s = i * chunk_rows
        return pl.multiple_of(s, chunk_rows) if chunk_rows % 8 == 0 else s

    def p1(i, acc):
        yc = y_ref[pl.ds(row0(i), chunk_rows), :].astype(jnp.float32)
        return acc + jnp.sum(yc, axis=0, keepdims=True)

    lane_sum = jax.lax.fori_loop(0, nchunk, p1,
                                 jnp.zeros((1, lanes), jnp.float32))
    mean = per_channel(lane_sum) * inv_count

    def p2(i, acc):
        d = y_ref[pl.ds(row0(i), chunk_rows), :].astype(jnp.float32) - mean
        return acc + jnp.sum(d * d, axis=0, keepdims=True)

    lane_sq = jax.lax.fori_loop(0, nchunk, p2,
                                jnp.zeros((1, lanes), jnp.float32))
    var = per_channel(lane_sq) * inv_count

    scale = g_ref[...] * jax.lax.rsqrt(var + eps)
    shift = b_ref[...] - mean * scale

    def p3(i, carry):
        yc = y_ref[pl.ds(row0(i), chunk_rows), :].astype(jnp.float32)
        o_ref[pl.ds(row0(i), chunk_rows), :] = jnp.maximum(
            yc * scale + shift, 0.0).astype(o_ref.dtype)
        return carry

    jax.lax.fori_loop(0, nchunk, p3, 0)


def _bn_stats_kernel(y_ref, s_ref, q_ref):
    # fallback (large y): accumulate per-lane sum / sum-of-squares over rows
    @pl.when(pl.program_id(0) == 0)
    def _():
        s_ref[...] = jnp.zeros_like(s_ref)
        q_ref[...] = jnp.zeros_like(q_ref)

    y = y_ref[...].astype(jnp.float32)
    s_ref[...] += jnp.sum(y, axis=0, keepdims=True)
    q_ref[...] += jnp.sum(y * y, axis=0, keepdims=True)


def _affine_act_kernel(x_ref, s_ref, b_ref, o_ref, *, act):
    y = x_ref[...].astype(jnp.float32) * s_ref[...] + b_ref[...]
    if act == "relu":
        y = jnp.maximum(y, 0.0)
    elif act == "tanh":
        y = jnp.tanh(y)
    o_ref[...] = y.astype(o_ref.dtype)


# --------------------------------------------------------------------------
# Tiling helpers
# --------------------------------------------------------------------------
def _largest_divisor_mult8(r, cap):
    cap8 = cap - cap % 8
    for t in range(cap8, 7, -8):
        if r % t == 0:
            return t
    return None


def _row_tile(r, row_bytes, cap=2048):
    """Row tile <= cap within the VMEM budget.  Prefers an exact divisor of r
    (no padding); otherwise returns a mult-of-8 tile and the caller pads."""
    budget = max(_VMEM_LIMIT // 3, 2 * 1024 * 1024)
    cap = min(cap, max(8, budget // max(row_bytes, 1)))
    cap -= cap % 8
    cap = max(cap, 8)
    if r <= cap:
        return r
    d = _largest_divisor_mult8(r, cap)
    if d is not None and d >= max(8, cap // 4):
        return d
    return cap


def _pad_rows(x, tm):
    pad = (-x.shape[0]) % tm
    if pad:
        x = jnp.pad(x, ((0, pad), (0, 0)))
    return x


def _matmul_tiles(m, k, n):
    budget = max(int(_VMEM_LIMIT * 0.6), 4 * 1024 * 1024)
    tn_cands = [t for t in range(min(n, 2048), 127, -128) if n % t == 0] or [n]
    for tn in tn_cands:
        w_bytes = 2 * k * tn * 2                   # double-buffered bf16 weight
        row_bytes = 2 * (k * 2) + 2 * (tn * 2)     # A row + out row, dbl-buffered
        avail = budget - w_bytes
        if avail < 8 * row_bytes:
            continue
        tm = _row_tile(m, row_bytes, cap=min(2048, avail // row_bytes))
        return tm, tn
    tn = 128 if n % 128 == 0 else n
    return _row_tile(m, 2 * (k + tn) * 2, cap=256), tn


# --------------------------------------------------------------------------
# Pallas wrappers
# --------------------------------------------------------------------------
def pallas_matmul(a_bf16, b_bf16):
    m, k = a_bf16.shape
    _, n = b_bf16.shape
    tm, tn = _matmul_tiles(m, k, n)
    a_p = _pad_rows(a_bf16, tm)
    mp = a_p.shape[0]
    out = pl.pallas_call(
        _matmul_kernel,
        out_shape=jax.ShapeDtypeStruct((mp, n), jnp.bfloat16),
        grid=(mp // tm, n // tn),
        in_specs=[pl.BlockSpec((tm, k), lambda i, j: (i, 0)),
                  pl.BlockSpec((k, tn), lambda i, j: (0, j))],
        out_specs=pl.BlockSpec((tm, tn), lambda i, j: (i, j)),
        compiler_params=pltpu.CompilerParams(
            dimension_semantics=("parallel", "parallel"),
            vmem_limit_bytes=_VMEM_LIMIT),
    )(a_p, b_bf16)
    return out if mp == m else out[:m]


def pallas_affine_act(x, scale_l, shift_l, act, out_dtype):
    r, l = x.shape
    in_b = 2 if x.dtype == jnp.bfloat16 else 4
    out_b = 2 if out_dtype == jnp.bfloat16 else 4
    tm = _row_tile(r, 2 * l * in_b + 2 * l * out_b)
    x_p = _pad_rows(x, tm)
    rp = x_p.shape[0]
    kern = functools.partial(_affine_act_kernel, act=act)
    out = pl.pallas_call(
        kern,
        out_shape=jax.ShapeDtypeStruct((rp, l), out_dtype),
        grid=(rp // tm,),
        in_specs=[pl.BlockSpec((tm, l), lambda i: (i, 0)),
                  pl.BlockSpec((1, l), lambda i: (0, 0)),
                  pl.BlockSpec((1, l), lambda i: (0, 0))],
        out_specs=pl.BlockSpec((tm, l), lambda i: (i, 0)),
        compiler_params=pltpu.CompilerParams(
            dimension_semantics=("parallel",),
            vmem_limit_bytes=_VMEM_LIMIT),
    )(x_p, scale_l, shift_l)
    return out if rp == r else out[:r]


def _bn_relu_fused(y2, gamma_l, beta_l, fold, inv_count):
    r, l = y2.shape
    chunk_cap = max(8, (128 * 1024) // (l * 4))    # ~128 KiB f32 per chunk
    if r <= chunk_cap:
        chunk = r
    else:
        chunk = _largest_divisor_mult8(r, chunk_cap) or r
    has_fold = fold is not None
    kern = functools.partial(_bn_relu_fused_kernel, inv_count=inv_count,
                             eps=float(_BN_EPS), chunk_rows=chunk,
                             has_fold=has_fold)
    args = (y2, gamma_l, beta_l) + ((fold,) if has_fold else ())
    return pl.pallas_call(
        kern,
        out_shape=jax.ShapeDtypeStruct((r, l), jnp.bfloat16),
        compiler_params=pltpu.CompilerParams(vmem_limit_bytes=_VMEM_LIMIT),
    )(*args)


def _bn_relu_tiled(y2, gamma, beta, c, count):
    # fallback for y too large to hold in VMEM as one block
    r, l = y2.shape
    tm = _row_tile(r, 2 * l * 2)
    y_p = _pad_rows(y2, tm)                        # zero rows do not perturb sums
    rp = y_p.shape[0]
    s, q = pl.pallas_call(
        _bn_stats_kernel,
        out_shape=(jax.ShapeDtypeStruct((1, l), jnp.float32),
                   jax.ShapeDtypeStruct((1, l), jnp.float32)),
        grid=(rp // tm,),
        in_specs=[pl.BlockSpec((tm, l), lambda i: (i, 0))],
        out_specs=(pl.BlockSpec((1, l), lambda i: (0, 0)),
                   pl.BlockSpec((1, l), lambda i: (0, 0))),
        compiler_params=pltpu.CompilerParams(
            dimension_semantics=("arbitrary",),
            vmem_limit_bytes=_VMEM_LIMIT),
    )(y_p)
    ch_sum = s.reshape(l // c, c).sum(axis=0)
    ch_sq = q.reshape(l // c, c).sum(axis=0)
    mean = ch_sum / count
    # NOTE: single-pass E[x^2]-mean^2 (f32 accumulation, clamped); the fused
    # path uses the centered two-pass formula -- acceptable for BN usage.
    var = jnp.maximum(ch_sq / count - mean * mean, 0.0)
    scale = gamma / jnp.sqrt(var + _BN_EPS)
    shift = beta - mean * scale
    scale_l = jnp.tile(scale, l // c).reshape(1, l)
    shift_l = jnp.tile(shift, l // c).reshape(1, l)
    return pallas_affine_act(y2, scale_l, shift_l, "relu", jnp.bfloat16)


# --------------------------------------------------------------------------
# ConvTranspose2d as direct matmul + phase-grouped col2im (no zero-stuffing)
# --------------------------------------------------------------------------
def _shift(t, axis, delta):
    # S[m] = T[m + delta] along `axis`, zero-padded at the boundary
    if delta == 0:
        return t
    pads = [(0, 0)] * t.ndim
    if delta < 0:
        pads[axis] = (1, 0)
        tp = jnp.pad(t, pads)
        return jax.lax.slice_in_dim(tp, 0, t.shape[axis], axis=axis)
    pads[axis] = (0, 1)
    tp = jnp.pad(t, pads)
    return jax.lax.slice_in_dim(tp, 1, t.shape[axis] + 1, axis=axis)


def _col2im_k4(taps, stride, padding):
    # taps: (N, H, W, 4, 4, C) bf16  ->  (N, Ho, Wo, C) bf16
    # TODO(synk): col2im phase-sum kept as XLA glue; next step is fusing it
    # into the matmul epilogue (whole-image tiles) to skip the taps round-trip.
    n, h, w, _, _, c = taps.shape
    if stride == 1:
        assert padding == 0 and h == 1 and w == 1
        return taps.reshape(n, 4, 4, c)
    assert stride == 2 and padding == 1
    # out[2m + ph]:  ph=0 -> taps(kh=1, i=m) + taps(kh=3, i=m-1)
    #                ph=1 -> taps(kh=2, i=m) + taps(kh=0, i=m+1)
    terms = {0: ((1, 0), (3, -1)), 1: ((2, 0), (0, 1))}
    rows = []
    for ph in (0, 1):
        cols = []
        for pw in (0, 1):
            acc = None
            for kh, dh in terms[ph]:
                for kw, dw in terms[pw]:
                    t = taps[:, :, :, kh, kw, :]          # (N, H, W, C)
                    t = _shift(_shift(t, 1, dh), 2, dw)
                    acc = t if acc is None else acc + t
            cols.append(acc)
        rows.append(jnp.stack(cols, axis=3))              # (N, H, W, 2, C)
    z = jnp.stack(rows, axis=2)                           # (N, H, 2, W, 2, C)
    return z.reshape(n, 2 * h, 2 * w, c)


def conv_transpose_direct(x_nhwc, w_t, stride, padding):
    # w_t: PyTorch ConvTranspose2d weight, shape (C_in, C_out, k, k)
    n, h, w, c_in = x_nhwc.shape
    k = w_t.shape[-1]
    c_out = w_t.shape[1]
    # pad C_out to a multiple of 8 so matmul N = 16*C_out is a multiple of 128
    # (full-lane unmasked stores); padded channels are sliced off after col2im.
    c_pad = (-c_out) % 8
    if c_pad:
        w_t = jnp.pad(w_t, ((0, 0), (0, c_pad), (0, 0), (0, 0)))
    c_eff = c_out + c_pad
    a = x_nhwc.reshape(n * h * w, c_in).astype(jnp.bfloat16)
    w_mat = jnp.transpose(w_t, (0, 2, 3, 1)).reshape(
        c_in, k * k * c_eff).astype(jnp.bfloat16)          # no kernel flip
    taps = pallas_matmul(a, w_mat)                          # (M, 16*C_eff) bf16
    taps = taps.reshape(n, h, w, k, k, c_eff)
    y = _col2im_k4(taps, stride, padding)
    if c_pad:
        y = y[..., :c_out]
    return y


# --------------------------------------------------------------------------
# BatchNorm(batch stats)+ReLU and bias+Tanh, lane-dense views
# --------------------------------------------------------------------------
def _lane_layout(n, h, w, c):
    # lane-dense 2-D view (rows, lanes) with channel == lane % c
    total = n * h * w * c
    if c % 128 == 0:
        return n * h * w, c, False        # lane is the channel directly
    if total % 128 == 0 and 128 % c == 0:
        return total // 128, 128, True
    if (w * c) % 128 == 0:
        return n * h, w * c, True
    return n * h * w, c, False            # masked-store fallback (lane == channel)


def batchnorm_relu(y, gamma, beta):
    n, h, w, c = y.shape
    r, l, needs_fold = _lane_layout(n, h, w, c)
    y2 = y.reshape(r, l)
    count = float(n * h * w)
    fused_bytes = r * l * 4 + (l * l * 4 if needs_fold else 0)
    if fused_bytes <= _FUSE_VMEM_BYTES:
        gamma_l = jnp.tile(gamma, l // c).reshape(1, l).astype(jnp.float32)
        beta_l = jnp.tile(beta, l // c).reshape(1, l).astype(jnp.float32)
        fold = None
        if needs_fold:
            lane_ch = jnp.arange(l) % c
            fold = (lane_ch[:, None] == lane_ch[None, :]).astype(jnp.float32)
        out2 = _bn_relu_fused(y2, gamma_l, beta_l, fold, 1.0 / count)
    else:
        out2 = _bn_relu_tiled(y2, gamma.astype(jnp.float32),
                              beta.astype(jnp.float32), c, count)
    return out2.reshape(n, h, w, c)


def bias_tanh(y, bias):
    n, h, w, c = y.shape
    r, l, _ = _lane_layout(n, h, w, c)
    y2 = y.reshape(r, l)
    bias_l = jnp.tile(bias, l // c).reshape(1, l).astype(jnp.float32)
    ones = jnp.ones((1, l), jnp.float32)
    out2 = pallas_affine_act(y2, ones, bias_l, "tanh", jnp.float32)
    return out2.reshape(n, h, w, c)


# --------------------------------------------------------------------------
# Generator forward (matches nn.Sequential in the PyTorch module)
# --------------------------------------------------------------------------
def generator_forward(z_nchw, params):
    x = jnp.transpose(z_nchw, (0, 2, 3, 1)).astype(jnp.float32)  # NCHW -> NHWC

    strides = [1, 2, 2, 2, 2]
    paddings = [0, 1, 1, 1, 1]
    for i in range(5):
        p = params[i]
        y = conv_transpose_direct(x, p["w"], strides[i], paddings[i])
        x = batchnorm_relu(y, p["gamma"], p["beta"])              # bf16 out

    p = params[5]
    y = conv_transpose_direct(x, p["w"], 2, 1)
    out_nhwc = bias_tanh(y, p["b"])
    return jnp.transpose(out_nhwc, (0, 3, 1, 2))                  # back to NCHW


# --------------------------------------------------------------------------
# Deterministic parameter init (PyTorch module __init__ shapes)
# --------------------------------------------------------------------------
def init_params(key, z_dim, channels_img, features_g):
    dims = [z_dim, features_g * 16, features_g * 8, features_g * 4,
            features_g * 2, features_g, channels_img]
    params = []
    for i in range(5):
        key, k1 = jax.random.split(key)
        w = 0.02 * jax.random.normal(k1, (dims[i], dims[i + 1], 4, 4),
                                     jnp.float32)
        params.append({
            "w": w,
            "gamma": jnp.ones((dims[i + 1],), jnp.float32),
            "beta": jnp.zeros((dims[i + 1],), jnp.float32),
        })
    key, k1, k2 = jax.random.split(key, 3)
    params.append({
        "w": 0.02 * jax.random.normal(k1, (dims[5], dims[6], 4, 4),
                                      jnp.float32),
        "b": 0.02 * jax.random.normal(k2, (dims[6],), jnp.float32),
    })
    return params


# --------------------------------------------------------------------------
# Silent self-check of the ConvTranspose lowering against XLA's dilated conv
# --------------------------------------------------------------------------
def _check_conv_transpose(key):
    for (h, cin, cout, s, p) in ((1, 16, 32, 1, 0), (5, 8, 16, 2, 1),
                                 (5, 8, 3, 2, 1)):
        key, k1, k2 = jax.random.split(key, 3)
        x = jax.random.normal(k1, (2, h, h, cin), jnp.float32)
        wt = 0.02 * jax.random.normal(k2, (cin, cout, 4, 4), jnp.float32)
        xb = x.astype(jnp.bfloat16).astype(jnp.float32)
        wb = wt.astype(jnp.bfloat16).astype(jnp.float32)
        ref = jax.lax.conv_general_dilated(
            xb, jnp.transpose(wb[:, :, ::-1, ::-1], (2, 3, 0, 1)),
            window_strides=(1, 1), padding=[(4 - 1 - p, 4 - 1 - p)] * 2,
            lhs_dilation=(s, s),
            dimension_numbers=("NHWC", "HWIO", "NHWC"),
            precision=jax.lax.Precision.HIGHEST)
        got = conv_transpose_direct(x, wt, s, p).astype(jnp.float32)
        assert got.shape == ref.shape, (got.shape, ref.shape)
        # taps are stored and summed in bf16 -> relative error ~2^-8
        assert bool(jnp.allclose(got, ref, rtol=5e-2, atol=5e-3))


if __name__ == "__main__":
    # small config: batch=2, z_dim=32, channels_img=3, features_g=8
    Z_DIM, CH_IMG, FEAT_G, BATCH = 32, 3, 8, 2

    key = jax.random.PRNGKey(0)
    kp, kz, kc = jax.random.split(key, 3)

    _check_conv_transpose(kc)

    params = init_params(kp, Z_DIM, CH_IMG, FEAT_G)
    z = jax.random.normal(kz, (BATCH, Z_DIM, 1, 1), jnp.float32)

    fwd = jax.jit(generator_forward)
    out = jax.block_until_ready(fwd(z, params))

    assert out.shape == (BATCH, CH_IMG, 128, 128), out.shape
    assert out.dtype == jnp.float32
    assert bool(jnp.all(jnp.isfinite(out)))
    assert bool(jnp.all(jnp.abs(out) <= 1.0 + 1e-6))   # tanh range
    print("KERNEL_OK")
</pallas_src>

<mosaic_0001>
module attributes {stable_mosaic.version = 11 : i64} {
  func.func @_matmul_kernel(%arg0: i32, %arg1: i32, %arg2: memref<2x16xbf16, #tpu.memory_space<vmem>>, %arg3: memref<16x512xbf16, #tpu.memory_space<vmem>>, %arg4: memref<2x512xbf16, #tpu.memory_space<vmem>>) attributes {dimension_semantics = [#tpu.dimension_semantics<parallel>, #tpu.dimension_semantics<parallel>], iteration_bounds = array<i64: 1, 1>, scalar_prefetch = 0 : i64, scratch_operands = 0 : i64, tpu.core_type = #tpu.core_type<tc>, window_params = [{transform_indices = @transform_0, window_bounds = array<i64: 2, 16>}, {transform_indices = @transform_1, window_bounds = array<i64: 16, 512>}, {transform_indices = @transform_2, window_bounds = array<i64: 2, 512>}]} {
    %c0 = arith.constant 0 : index
    %c0_0 = arith.constant 0 : index
    %0 = vector.load %arg2[%c0, %c0_0] : memref<2x16xbf16, #tpu.memory_space<vmem>>, vector<2x16xbf16>
    %c0_1 = arith.constant 0 : index
    %c0_2 = arith.constant 0 : index
    %1 = vector.load %arg3[%c0_1, %c0_2] : memref<16x512xbf16, #tpu.memory_space<vmem>>, vector<16x512xbf16>
    %cst = arith.constant dense<0.000000e+00> : vector<2x512xf32>
    %2 = tpu.matmul %0, %1, %cst {dimension_numbers = #tpu.dot_dimension_numbers<[1], [0], [0], [1], [0, 0, 1, 1], [], []>} : vector<2x16xbf16>, vector<16x512xbf16>, vector<2x512xf32> -> vector<2x512xf32>
    %3 = arith.truncf %2 : vector<2x512xf32> to vector<2x512xbf16>
    %c0_3 = arith.constant 0 : index
    %c0_4 = arith.constant 0 : index
    %4 = vector.load %arg4[%c0_3, %c0_4] : memref<2x512xbf16, #tpu.memory_space<vmem>>, vector<2x512xbf16>
    tpu.vector_store %arg4[%c0_3, %c0_4], %3 {strides = array<i32>} : memref<2x512xbf16, #tpu.memory_space<vmem>>, vector<2x512xbf16>,
    return
  }
  func.func @transform_0(%arg0: i32, %arg1: i32) -> (i32, i32) {
    %c0_i32 = arith.constant 0 : i32
    %c0_i32_0 = arith.constant 0 : i32
    return %arg0, %c0_i32 : i32, i32
  }
  func.func @transform_1(%arg0: i32, %arg1: i32) -> (i32, i32) {
    %c0_i32 = arith.constant 0 : i32
    %c0_i32_0 = arith.constant 0 : i32
    return %c0_i32, %arg1 : i32, i32
  }
  func.func @transform_2(%arg0: i32, %arg1: i32) -> (i32, i32) {
    %c0_i32 = arith.constant 0 : i32
    return %arg0, %arg1 : i32, i32
  }
}

</mosaic_0001>

<bundles_post_ra>
// kernel: tpu_custom_call.1
= control target key start
LH: loop header
LB: loop body
LE: loop exit
PB: predicated region body
PF: predicated region fallthrough
CT: control target
= control target key end

     0   :  { %7 = vsyncpa [#allocation3], 0  ;;  %s297_s0 = inlined_call_operand.hbm [shape: bf16[2,16], index: 0, kind: input, shape index: {}]   ;;  %s298_s1 = inlined_call_operand.hbm [shape: bf16[16,512], index: 1, kind: input, shape index: {}]   ;;  %s299_s2 = inlined_call_operand.hbm [shape: bf16[2,512], index: 2, kind: output, shape index: {}]  }
   0x1   :  { %8 = vsyncpa [#allocation6], 0 }
   0x2   :  { %9 = vsyncpa [#allocation4], 0  ;;  %s15_s11 = sshll.u32 %s297_s0, 4  ;;  %s268_s12 = smov [#allocation2]   ;;  %s16_s11 = int_to_ptr.hbm [resolvable:$true] %s15_s11 }
   0x3   :  { %s17_s13 = sshll.u32 %s268_s12, 4  ;;  %s25_s16 = sshll.u32 %s298_s1, 4  ;;  %s18_s13 = int_to_ptr.vmem [resolvable:$true] %s17_s13  ;;  %s26_s16 = int_to_ptr.hbm [resolvable:$true] %s25_s16 }
   0x4   :  { %20 = dma.hbm_to_vmem [thread:$0]  %s16_s11, 16, %s18_s13, [#allocation3]  }
   0x5   :  { %s269_s17 = smov [#allocation5]   ;;  %s270_s19 = smov 256  }
   0x6   :  { %s27_s18 = sshll.u32 %s269_s17, 4  ;;  %s271_s20 = smov 16   ;;  %s28_s18 = int_to_ptr.vmem [resolvable:$true] %s27_s18 }
   0x7   :  { %33 = dma.hbm_to_vmem [thread:$0]  %s26_s16, 512, %s28_s18, [#allocation6], %s270_s19, %s270_s19, %s271_s20  }
   0x8   :  { %262 = dma.done.wait [#allocation3], 16  }
   0x9   :  { %263 = vsyncadd [#allocation3], 4294967280 }
   0xa   :  { %264 = dma.done.wait [#allocation6], 512  }
   0xb   :  { %265 = vsyncadd [#allocation6], 4294966784  ;;  %v163_v0 = vld [vmem:[#allocation5] sm:$0xf]  ;;  %v183_v1 = vld [vmem:[#allocation5 + $0xc] sm:$0xf0] }
   0xc   :  { %v181_v2 = vld [vmem:[#allocation5 + $0x4] sm:$0xf]  ;;  %v164_v3 = vor.u32 %v183_v1, %v163_v0  ;;  %v165_v4 = vld [vmem:[#allocation5 + $0x10] sm:$0xf0]  ;;  %v171_v5 = vld [vmem:[#allocation5 + $0x8] sm:$0xf] }
   0xd   :  { %v184_v6 = vld [vmem:[#allocation5 + $0x14] sm:$0xf0]  ;;  %v168_v7 = vor.u32 %v181_v2, %v165_v4  ;;  %v182_v9 = vld [vmem:[#allocation5 + $0xc] sm:$0xf]  ;;  %v173_v10 = vld [vmem:[#allocation5 + $0x18] sm:$0xf0] }
   0xe   :  { %v172_v8 = vor.u32 %v184_v6, %v171_v5  ;;  %79 = vmatpush.bf16.msra.mxu0 %v164_v3  ;;  %v176_v11 = vor.u32 %v182_v9, %v173_v10  ;;  %v43_v12 = vld [vmem:[#allocation2] sm:$0x1]  ;;  %vm68_vm0 = vcmask 130048   ;;  %vm131_vm1 = vcmask 1040384   ;;  %s272_s0 = smov [#allocation7]   ;;  %s150_s23 = sshll.u32 %s299_s2, 4  ;;  %s151_s23 = int_to_ptr.hbm [resolvable:$true] %s150_s23 }
   0xf   :  { %92 = vmatpush.bf16.msra.mxu1 %v168_v7  ;;  %vm135_vm2 = vcmask 1042434   ;;  %s148_s1 = sshll.u32 %s272_s0, 4  ;;  %vm139_vm3 = vcmask 1041408   ;;  %s149_s1 = int_to_ptr.vmem [resolvable:$true] %s148_s1 }
  0x10   :  { %105 = vmatpush.bf16.msra.mxu2 %v172_v8  ;;  %118 = vmatpush.bf16.msra.mxu3 %v176_v11 }
  0x11   :  { %177 = vmatmul.msk.bf16.vlgmr.msra.gmra.mxu0 %vm68_vm0, %v43_v12 }
  0x12   :  { %178 = vmatmul.msk.bf16.vlgmr.msra.gmra.mxu1 %vm68_vm0, %v43_v12 }
  0x13   :  { %179 = vmatmul.msk.bf16.vlgmr.msra.gmra.mxu2 %vm68_vm0, %v43_v12  ;;  %180 = vmatmul.msk.bf16.vlgmr.msra.gmra.mxu3 %vm68_vm0, %v43_v12 }
  0x8e   :  { %v81_v13 = vpop.f32.mrf.mxu0 }
  0x8f   :  { %v94_v14 = vpop.f32.mrf.mxu1 }
  0x90   :  { %v124_v15 = vpack.c.bf16 %v94_v14, %v81_v13 }
  0x92   :  { %v128_v19 = vrot.slane %v124_v15, 3 }
  0x94   :  { %v134_v24 = vsel %vm131_vm1, %v124_v15, %v128_v19 }
  0x96   :  { %v107_v16 = vpop.f32.mrf.mxu2  ;;  %v120_v17 = vpop.f32.mrf.mxu3 }
  0x97   :  { %v83_v18 = vpop.f32.mrf.mxu0  ;;  %v125_v20 = vpack.c.bf16 %v120_v17, %v107_v16  ;;  %v96_v21 = vpop.f32.mrf.mxu1 }
  0x99   :  { %v129_v22 = vrot.slane %v125_v20, 6  ;;  %v130_v23 = vrot.slane %v125_v20, 1 }
  0x9b   :  { %v138_v25 = vsel %vm135_vm2, %v129_v22, %v130_v23 }
  0x9c   :  { %v140_v26 = vsel %vm139_vm3, %v134_v24, %v138_v25 }
  0x9d   :  { %142 = vst [vmem:[#allocation7] sm:$0xf] %v140_v26 }
  0x9e   :  { %v109_v27 = vpop.f32.mrf.mxu2  ;;  %v122_v28 = vpop.f32.mrf.mxu3  ;;  %153 = dma.vmem_to_hbm [thread:$0]  %s149_s1, 64, %s151_s23, [#allocation4]  }
  0x9f   :  { %266 = dma.done.wait [#allocation4], 64  }
  0xa0   :  { %267 = vsyncadd [#allocation4], 4294967232 }
  0xa1   :  { %158 = vsyncpa [#allocation3], 1 }
  0xa2   :  { %159 = vsyncpa [#allocation6], 1 }
  0xa3   :  { %160 = vsyncpa [#allocation4], 1 }

</bundles_post_ra>
